<compile_context>
chip_gen: v7x
topology: tpu7x:2x2x1
jax: 0.10.0
libtpu: 0.0.40
codegen_flags: <defaults>
</compile_context>

<pallas_src>
import functools
import math

import jax
import jax.numpy as jnp
from jax.experimental import pallas as pl
from jax.experimental.pallas import tpu as pltpu


def _time_mlp_kernel(time_ref, freqs2_ref, w1_ref, b1_ref, w2_ref, b2_ref, o_ref,
                     *, total_time_steps, half_dim):
    """Fused: sinusoidal embedding -> Linear(128,512) -> SiLU -> Linear(512,512).

    time_ref  : (B, 1)      int32 in VMEM  (timestep indices)
    freqs2_ref: (1, 128)    f32   in VMEM  (frequency row duplicated: [f | f])
    w1_ref    : (128, 512)  bf16  in VMEM
    b1_ref    : (1, 512)    f32   in VMEM
    w2_ref    : (512, 512)  bf16  in VMEM
    b2_ref    : (1, 512)    f32   in VMEM
    o_ref     : (B, 512)    f32
    """
    # Clamp indices (unchecked-OOB safety / nn.Embedding valid range), then
    # compute the sinusoid directly instead of gathering from a 512 KB table.
    t = jnp.clip(time_ref[...], 0, total_time_steps - 1).astype(jnp.float32)  # (B, 1)
    args = t * freqs2_ref[...]                                                # (B, 128)
    lane = jax.lax.broadcasted_iota(jnp.int32, args.shape, 1)
    x = jnp.where(lane < half_dim, jnp.sin(args), jnp.cos(args))              # [sin|cos], f32
    x = x.astype(jnp.bfloat16)                                                # bf16 into MXU

    h = jnp.dot(x, w1_ref[...], preferred_element_type=jnp.float32)           # f32 accumulate
    h = h + b1_ref[...]                                                       # f32 bias
    h = h * jax.nn.sigmoid(h)                                                 # SiLU in f32 (EUP)
    y = jnp.dot(h.astype(jnp.bfloat16), w2_ref[...],
                preferred_element_type=jnp.float32)
    y = y + b2_ref[...]
    o_ref[...] = y.astype(o_ref.dtype)


def make_inv_freqs(time_emb_dims=128):
    """Frequencies exactly mirroring the torch table construction."""
    half_dim = time_emb_dims // 2
    emb = math.log(10000.0) / (half_dim - 1)
    return jnp.exp(jnp.arange(half_dim, dtype=jnp.float32) * -emb)            # (half_dim,)


def init_params(key, time_emb_dims=128, time_emb_dims_exp=512):
    """Deterministic init matching nn.Linear's bounds; weights stored bf16."""
    k1, k2, k3, k4 = jax.random.split(key, 4)
    bound1 = 1.0 / math.sqrt(time_emb_dims)
    bound2 = 1.0 / math.sqrt(time_emb_dims_exp)
    w1 = jax.random.uniform(k1, (time_emb_dims, time_emb_dims_exp),
                            jnp.float32, -bound1, bound1)
    b1 = jax.random.uniform(k2, (1, time_emb_dims_exp), jnp.float32, -bound1, bound1)
    w2 = jax.random.uniform(k3, (time_emb_dims_exp, time_emb_dims_exp),
                            jnp.float32, -bound2, bound2)
    b2 = jax.random.uniform(k4, (1, time_emb_dims_exp), jnp.float32, -bound2, bound2)
    return w1.astype(jnp.bfloat16), b1, w2.astype(jnp.bfloat16), b2


def sinusoidal_position_embeddings(time, freqs, w1, b1, w2, b2, *, total_time_steps=1000):
    """time: (B,) int32 timestep indices -> (B, time_emb_dims_exp) float32."""
    B = time.shape[0]
    half_dim = freqs.shape[-1]
    in_dim, hid_dim = w1.shape
    out_dim = w2.shape[1]
    assert in_dim == 2 * half_dim

    # Lane-duplicated frequency row so the kernel builds the [sin | cos] layout
    # with a single lane-dense select (no sub-128-lane concat inside the kernel).
    freqs2 = jnp.concatenate([freqs, freqs], axis=-1).reshape(1, in_dim)
    time2d = time.reshape(B, 1).astype(jnp.int32)

    vmem = pl.BlockSpec(memory_space=pltpu.MemorySpace.VMEM)

    flops = 2 * B * (in_dim * hid_dim + hid_dim * out_dim)
    transcendentals = B * (in_dim + hid_dim)       # sin/cos + sigmoid
    bytes_accessed = (
        time2d.size * 4 + freqs2.size * 4
        + w1.size * w1.dtype.itemsize + w2.size * w2.dtype.itemsize
        + b1.size * 4 + b2.size * 4
        + B * out_dim * 4
    )
    cost = pl.CostEstimate(flops=flops, transcendentals=transcendentals,
                           bytes_accessed=bytes_accessed)

    kernel = functools.partial(_time_mlp_kernel,
                               total_time_steps=total_time_steps,
                               half_dim=half_dim)
    return pl.pallas_call(
        kernel,
        out_shape=jax.ShapeDtypeStruct((B, out_dim), jnp.float32),
        in_specs=[vmem, vmem, vmem, vmem, vmem, vmem],
        out_specs=vmem,
        cost_estimate=cost,
    )(time2d, freqs2, w1, b1, w2, b2)


def _reference(time, freqs, w1, b1, w2, b2, total_time_steps=1000):
    """Plain-JAX reference with the same bf16-weight / f32-accumulate numerics."""
    t = jnp.clip(time, 0, total_time_steps - 1).astype(jnp.float32)
    args = t[:, None] * freqs[None, :]
    x = jnp.concatenate([jnp.sin(args), jnp.cos(args)], axis=-1)
    x = x.astype(jnp.bfloat16).astype(jnp.float32)
    h = x @ w1.astype(jnp.float32) + b1
    h = h * jax.nn.sigmoid(h)
    h = h.astype(jnp.bfloat16).astype(jnp.float32)
    return h @ w2.astype(jnp.float32) + b2


if __name__ == "__main__":
    key = jax.random.PRNGKey(0)
    k_params, k_time = jax.random.split(key)

    total_time_steps = 1000
    time_emb_dims = 128
    time_emb_dims_exp = 512
    batch = 8  # small, sublane-aligned

    freqs = make_inv_freqs(time_emb_dims)
    w1, b1, w2, b2 = init_params(k_params, time_emb_dims, time_emb_dims_exp)

    time = jax.random.randint(k_time, (batch,), 0, total_time_steps, dtype=jnp.int32)

    out = sinusoidal_position_embeddings(time, freqs, w1, b1, w2, b2,
                                         total_time_steps=total_time_steps)
    out = jax.block_until_ready(out)

    ref = _reference(time, freqs, w1, b1, w2, b2, total_time_steps)
    assert out.shape == (batch, time_emb_dims_exp)
    max_err = float(jnp.max(jnp.abs(out - ref)))
    assert jnp.allclose(out, ref, atol=5e-3, rtol=5e-3), max_err

    print("KERNEL_OK")
</pallas_src>

<mosaic_0001>
module attributes {stable_mosaic.version = 11 : i64} {
  func.func @_time_mlp_kernel(%arg0: memref<8x1xi32, #tpu.memory_space<vmem>>, %arg1: memref<1x128xf32, #tpu.memory_space<vmem>>, %arg2: memref<128x512xbf16, #tpu.memory_space<vmem>>, %arg3: memref<1x512xf32, #tpu.memory_space<vmem>>, %arg4: memref<512x512xbf16, #tpu.memory_space<vmem>>, %arg5: memref<1x512xf32, #tpu.memory_space<vmem>>, %arg6: memref<8x512xf32, #tpu.memory_space<vmem>>) attributes {dimension_semantics = [], scalar_prefetch = 0 : i64, scratch_operands = 0 : i64, tpu.core_type = #tpu.core_type<tc>} {
    %c0 = arith.constant 0 : index
    %c0_0 = arith.constant 0 : index
    %0 = vector.load %arg0[%c0, %c0_0] : memref<8x1xi32, #tpu.memory_space<vmem>>, vector<8x1xi32>
    %c0_i32 = arith.constant 0 : i32
    %c999_i32 = arith.constant 999 : i32
    %1 = vector.broadcast %c0_i32 : i32 to vector<8x1xi32>
    %2 = arith.maxsi %1, %0 : vector<8x1xi32>
    %3 = vector.broadcast %c999_i32 : i32 to vector<8x1xi32>
    %4 = arith.minsi %3, %2 : vector<8x1xi32>
    %5 = arith.sitofp %4 : vector<8x1xi32> to vector<8x1xf32>
    %c0_1 = arith.constant 0 : index
    %c0_2 = arith.constant 0 : index
    %6 = vector.load %arg1[%c0_1, %c0_2] : memref<1x128xf32, #tpu.memory_space<vmem>>, vector<1x128xf32>
    %7 = vector.broadcast %5 : vector<8x1xf32> to vector<8x128xf32>
    %8 = vector.broadcast %6 : vector<1x128xf32> to vector<8x128xf32>
    %9 = arith.mulf %7, %8 : vector<8x128xf32>
    %10 = tpu.iota {dimensions = array<i32: 1>} : vector<8x128xi32>
    %c64_i32 = arith.constant 64 : i32
    %11 = vector.broadcast %c64_i32 : i32 to vector<8x128xi32>
    %12 = arith.cmpi slt, %10, %11 : vector<8x128xi32>
    %13 = math.sin %9 : vector<8x128xf32>
    %14 = math.cos %9 : vector<8x128xf32>
    %15 = arith.select %12, %13, %14 : vector<8x128xi1>, vector<8x128xf32>
    %16 = arith.truncf %15 : vector<8x128xf32> to vector<8x128xbf16>
    %c0_3 = arith.constant 0 : index
    %c0_4 = arith.constant 0 : index
    %17 = vector.load %arg2[%c0_3, %c0_4] : memref<128x512xbf16, #tpu.memory_space<vmem>>, vector<128x512xbf16>
    %cst = arith.constant dense<0.000000e+00> : vector<8x512xf32>
    %18 = tpu.matmul %16, %17, %cst {dimension_numbers = #tpu.dot_dimension_numbers<[1], [0], [0], [1], [0, 0, 1, 1], [], []>} : vector<8x128xbf16>, vector<128x512xbf16>, vector<8x512xf32> -> vector<8x512xf32>
    %c0_5 = arith.constant 0 : index
    %c0_6 = arith.constant 0 : index
    %19 = vector.load %arg3[%c0_5, %c0_6] : memref<1x512xf32, #tpu.memory_space<vmem>>, vector<1x512xf32>
    %20 = vector.broadcast %19 : vector<1x512xf32> to vector<8x512xf32>
    %21 = arith.addf %18, %20 : vector<8x512xf32>
    %22 = arith.negf %21 : vector<8x512xf32>
    %23 = math.exp %22 : vector<8x512xf32>
    %cst_7 = arith.constant 1.000000e+00 : f32
    %24 = vector.broadcast %cst_7 : f32 to vector<8x512xf32>
    %25 = arith.addf %24, %23 : vector<8x512xf32>
    %26 = arith.divf %24, %25 : vector<8x512xf32>
    %27 = arith.mulf %21, %26 : vector<8x512xf32>
    %28 = arith.truncf %27 : vector<8x512xf32> to vector<8x512xbf16>
    %c0_8 = arith.constant 0 : index
    %c0_9 = arith.constant 0 : index
    %29 = vector.load %arg4[%c0_8, %c0_9] : memref<512x512xbf16, #tpu.memory_space<vmem>>, vector<512x512xbf16>
    %cst_10 = arith.constant dense<0.000000e+00> : vector<8x512xf32>
    %30 = tpu.matmul %28, %29, %cst_10 {dimension_numbers = #tpu.dot_dimension_numbers<[1], [0], [0], [1], [0, 0, 1, 1], [], []>} : vector<8x512xbf16>, vector<512x512xbf16>, vector<8x512xf32> -> vector<8x512xf32>
    %c0_11 = arith.constant 0 : index
    %c0_12 = arith.constant 0 : index
    %31 = vector.load %arg5[%c0_11, %c0_12] : memref<1x512xf32, #tpu.memory_space<vmem>>, vector<1x512xf32>
    %32 = vector.broadcast %31 : vector<1x512xf32> to vector<8x512xf32>
    %33 = arith.addf %30, %32 : vector<8x512xf32>
    %c0_13 = arith.constant 0 : index
    %c0_14 = arith.constant 0 : index
    %34 = vector.load %arg6[%c0_13, %c0_14] : memref<8x512xf32, #tpu.memory_space<vmem>>, vector<8x512xf32>
    tpu.vector_store %arg6[%c0_13, %c0_14], %33 {strides = array<i32>} : memref<8x512xf32, #tpu.memory_space<vmem>>, vector<8x512xf32>,
    return
  }
}

</mosaic_0001>

<bundles_post_ra>
// kernel: tpu_custom_call.1
= control target key start
LH: loop header
LB: loop body
LE: loop exit
PB: predicated region body
PF: predicated region fallthrough
CT: control target
= control target key end

     0   :  { %11 = vsyncpa [#allocation3], 0  ;;  %s2274_s0 = inlined_call_operand.vmem [shape: s32[8,1], index: 0, kind: input, shape index: {}]   ;;  %s2275_s1 = inlined_call_operand.vmem [shape: f32[1,128], index: 1, kind: input, shape index: {}]   ;;  %s2276_s2 = inlined_call_operand.hbm [shape: bf16[128,512], index: 2, kind: input, shape index: {}]   ;;  %s2277_s3 = inlined_call_operand.vmem [shape: f32[1,512], index: 3, kind: input, shape index: {}]   ;;  %s2278_s4 = inlined_call_operand.hbm [shape: bf16[512,512], index: 4, kind: input, shape index: {}]   ;;  %s2279_s5 = inlined_call_operand.vmem [shape: f32[1,512], index: 5, kind: input, shape index: {}]   ;;  %s2280_s6 = inlined_call_operand.hbm [shape: f32[8,512], index: 6, kind: output, shape index: {}]  }
   0x1   :  { %12 = vsyncpa [#allocation6], 0 }
   0x2   :  { %13 = vsyncpa [#allocation4], 0  ;;  %s2120_s21 = smov [#allocation2]   ;;  %s2048_s25 = scalar_lea.hbm %s2276_s2, 4096 }
   0x3   :  { %s23_s22 = sshll.u32 %s2120_s21, 4  ;;  %p2049_p0 = scmp.ne.s32.totalorder %s2276_s2, %s2048_s25  ;;  %s24_s22 = int_to_ptr.vmem [resolvable:$true] %s23_s22 }
   0x4   :  { %p2052_p1 = scmp.lt.u32.totalorder %s2048_s25, %s2276_s2 }
   0x6   :  { %p2054_p2 = pnand %p2052_p1, %p2049_p0 }
   0x8   :  { %2057 = shalt.err (!%p2054_p2)
}
   0x9   :  { %s2058_s30 = scalar_lea.vmem %s24_s22, 4096  ;;  %p2063_p4 = scmp.lt.s32.totalorder %s24_s22, %s24_s22 }
   0xa   :  { %p2059_p3 = scmp.ne.s32.totalorder %s24_s22, %s2058_s30  ;;  %p2064_p5 = scmp.lt.s32.totalorder %s2058_s30, %s2058_s30 }
   0xc   :  { %p2065_p6 = por %p2064_p5, %p2063_p4 }
   0xe   :  { %p2066_p7 = pnand %p2065_p6, %p2059_p3 }
  0x10   :  { %2069 = shalt.err (!%p2066_p7)
}
  0x11   :  { %s2121_s7 = smov 256   ;;  %s2122_s8 = smov 16  }
  0x12   :  { %29 = dma.hbm_to_vmem [thread:$0]  %s2276_s2, 4096, %s24_s22, [#allocation3], %s2121_s7, %s2121_s7, %s2122_s8  }
  0x13   :  { %s2123_s11 = smov [#allocation5]   ;;  %s2070_s15 = scalar_lea.hbm %s2278_s4, 16384 }
  0x14   :  { %s37_s12 = sshll.u32 %s2123_s11, 4  ;;  %p2071_p8 = scmp.ne.s32.totalorder %s2278_s4, %s2070_s15  ;;  %s38_s12 = int_to_ptr.vmem [resolvable:$true] %s37_s12 }
  0x15   :  { %p2074_p9 = scmp.lt.u32.totalorder %s2070_s15, %s2278_s4 }
  0x17   :  { %p2076_p10 = pnand %p2074_p9, %p2071_p8 }
  0x19   :  { %2079 = shalt.err (!%p2076_p10)
}
  0x1a   :  { %s2080_s20 = scalar_lea.vmem %s38_s12, 16384  ;;  %p2085_p12 = scmp.lt.s32.totalorder %s38_s12, %s38_s12 }
  0x1b   :  { %p2081_p11 = scmp.ne.s32.totalorder %s38_s12, %s2080_s20  ;;  %p2086_p13 = scmp.lt.s32.totalorder %s2080_s20, %s2080_s20 }
  0x1d   :  { %p2087_p0 = por %p2086_p13, %p2085_p12 }
  0x1f   :  { %p2088_p1 = pnand %p2087_p0, %p2081_p11 }
  0x21   :  { %2091 = shalt.err (!%p2088_p1)
}
  0x22   :  { %43 = dma.hbm_to_vmem [thread:$0]  %s2278_s4, 16384, %s38_s12, [#allocation6], %s2121_s7, %s2121_s7, %s2122_s8  }
  0x23   :  { %2114 = dma.done.wait [#allocation3], 4096  }
  0x24   :  { %2115 = vsyncadd [#allocation3], 4294963200 }
  0x25   :  { %2116 = dma.done.wait [#allocation6], 16384  }
  0x26   :  { %2117 = vsyncadd [#allocation6], 4294950912  ;;  %v2124_v0 = vmov 0   ;;  %v53_v1 = vld [vmem:[%s2274_s0] sm:$0xff]  ;;  %v1790_v6 = vld [vmem:[#allocation2 + $0xc] ss:$16 sps:$4 sm:$0xff]  }
  0x27   :  { %1787 = vset.pattern.permute.xlu0 %v2124_v0  ;;  %530 = vmatprep.mubr.bf16.mxu0 %v2124_v0  ;;  %vm54_vm0 = vcmp.gt.s32.totalorder %v53_v1, 0  ;;  %v1788_v5 = vld [vmem:[#allocation2 + $0x4] ss:$16 sps:$4 sm:$0xff]   ;;  %v1792_v7 = vld [vmem:[#allocation2] ss:$16 sps:$4 sm:$0xff]   ;;  %s2131_s26 = smov [#allocation7]  }
  0x28   :  { %571 = vmatprep.mubr.bf16.mxu1 %v2124_v0  ;;  %v55_v2 = vsel %vm54_vm0, %v53_v1, 0  ;;  %v1793_v8 = vld [vmem:[#allocation2 + $0x8] ss:$16 sps:$4 sm:$0xff]   ;;  %498 = vmatprep.subr.bf16.mxu0 %v1788_v5  ;;  %v1794_v9 = vld [vmem:[#allocation2 + $0x24] ss:$16 sps:$4 sm:$0xff]   ;;  %s1576_s27 = sshll.u32 %s2131_s26, 4  ;;  %s1577_s27 = int_to_ptr.vmem [resolvable:$true] %s1576_s27 }
  0x29   :  { %vm56_vm1 = vcmp.lt.s32.totalorder %v55_v2, 999  ;;  %539 = vmatprep.subr.bf16.mxu1 %v1790_v6  ;;  %499 = vmatpush1.bf16.msra.mxu0 %v1792_v7  ;;  %v1796_v10 = vld [vmem:[#allocation2 + $0x2c] ss:$16 sps:$4 sm:$0xff]   ;;  %v1798_v11 = vld [vmem:[#allocation2 + $0x20] ss:$16 sps:$4 sm:$0xff]   ;;  %p2097_p3 = scmp.lt.s32.totalorder %s1577_s27, %s1577_s27 }
  0x2a   :  { %v57_v3 = vsel %vm56_vm1, %v55_v2, 999  ;;  %540 = vmatpush1.bf16.msra.mxu1 %v1793_v8  ;;  %v1799_v12 = vld [vmem:[#allocation2 + $0x28] ss:$16 sps:$4 sm:$0xff]   ;;  %500 = vmatprep.subr.bf16.mxu0 %v1794_v9  ;;  %v1800_v13 = vld [vmem:[#allocation2 + $0x44] ss:$16 sps:$4 sm:$0xff]  }
  0x2b   :  { %v58_v4 = vcvt.s32.f32 %v57_v3  ;;  %541 = vmatprep.subr.bf16.mxu1 %v1796_v10  ;;  %v1802_v14 = vld [vmem:[#allocation2 + $0x4c] ss:$16 sps:$4 sm:$0xff]   ;;  %v1804_v15 = vld [vmem:[#allocation2 + $0x40] ss:$16 sps:$4 sm:$0xff]   ;;  %v1805_v16 = vld [vmem:[#allocation2 + $0x48] ss:$16 sps:$4 sm:$0xff]  }
  0x2c   :  { %v1806_v17 = vld [vmem:[#allocation2 + $0x64] ss:$16 sps:$4 sm:$0xff]   ;;  %v1808_v18 = vld [vmem:[#allocation2 + $0x6c] ss:$16 sps:$4 sm:$0xff]   ;;  %v1810_v19 = vld [vmem:[#allocation2 + $0x60] ss:$16 sps:$4 sm:$0xff]  }
  0x2d   :  { %62 = vperm.xlu0 %1787, %v58_v4   ;;  %501 = vmatpush1.bf16.msra.mxu0 %v1798_v11  ;;  %v1811_v20 = vld [vmem:[#allocation2 + $0x68] ss:$16 sps:$4 sm:$0xff]   ;;  %v1812_v21 = vld [vmem:[#allocation2 + $0x84] ss:$16 sps:$4 sm:$0xff]   ;;  %v1814_v22 = vld [vmem:[#allocation2 + $0x8c] ss:$16 sps:$4 sm:$0xff]  }
  0x2e   :  { %542 = vmatpush1.bf16.msra.mxu1 %v1799_v12  ;;  %502 = vmatprep.subr.bf16.mxu0 %v1800_v13  ;;  %v1816_v23 = vld [vmem:[#allocation2 + $0x80] ss:$16 sps:$4 sm:$0xff]   ;;  %v1817_v24 = vld [vmem:[#allocation2 + $0x88] ss:$16 sps:$4 sm:$0xff]   ;;  %v1818_v25 = vld [vmem:[#allocation2 + $0xa4] ss:$16 sps:$4 sm:$0xff]  }
  0x2f   :  { %543 = vmatprep.subr.bf16.mxu1 %v1802_v14  ;;  %v1820_v26 = vld [vmem:[#allocation2 + $0xac] ss:$16 sps:$4 sm:$0xff]   ;;  %v1822_v27 = vld [vmem:[#allocation2 + $0xa0] ss:$16 sps:$4 sm:$0xff]   ;;  %v1823_v28 = vld [vmem:[#allocation2 + $0xa8] ss:$16 sps:$4 sm:$0xff]  }
  0x30   :  { %v1824_v29 = vld [vmem:[#allocation2 + $0xc4] ss:$16 sps:$4 sm:$0xff]   ;;  %v1826_v30 = vld [vmem:[#allocation2 + $0xcc] ss:$16 sps:$4 sm:$0xff]   ;;  %v1828_v31 = vld [vmem:[#allocation2 + $0xc0] ss:$16 sps:$4 sm:$0xff]  }
  0x31   :  { %503 = vmatpush1.bf16.msra.mxu0 %v1804_v15  ;;  %v1829_v32 = vld [vmem:[#allocation2 + $0xc8] ss:$16 sps:$4 sm:$0xff]   ;;  %v1830_v33 = vld [vmem:[#allocation2 + $0xe4] ss:$16 sps:$4 sm:$0xff]   ;;  %v1832_v34 = vld [vmem:[#allocation2 + $0xec] ss:$16 sps:$4 sm:$0xff]  }
  0x32   :  { %544 = vmatpush1.bf16.msra.mxu1 %v1805_v16  ;;  %504 = vmatprep.subr.bf16.mxu0 %v1806_v17  ;;  %v1834_v35 = vld [vmem:[#allocation2 + $0xe0] ss:$16 sps:$4 sm:$0xff]   ;;  %v1835_v36 = vld [vmem:[#allocation2 + $0xe8] ss:$16 sps:$4 sm:$0xff]   ;;  %v1838_v37 = vld [vmem:[#allocation5 + $0x4] ss:$16 sps:$4 sm:$0xff]  }
  0x33   :  { %545 = vmatprep.subr.bf16.mxu1 %v1808_v18  ;;  %v1841_v38 = vld [vmem:[#allocation5 + $0xc] ss:$16 sps:$4 sm:$0xff]   ;;  %v1586_v39 = vld [vmem:[%s2275_s1] ss:$0 sm:$0xff]  ;;  %v2125_v52 = vmov 683565275  }
  0x34   :  { %v2126_v54 = vmov 2475754826   ;;  %v2127_v57 = vmov 2131351028   ;;  %v2128_v60 = vmov 2102212464  }
  0x35   :  { %505 = vmatpush1.bf16.msra.mxu0 %v1810_v19  ;;  %v2129_v63 = vmov 920167782   ;;  %v2130_v2 = vmov 1326507024  }
  0x36   :  { %546 = vmatpush1.bf16.msra.mxu1 %v1811_v20  ;;  %506 = vmatprep.subr.bf16.mxu0 %v1812_v21 }
  0x37   :  { %547 = vmatprep.subr.bf16.mxu1 %v1814_v22 }
  0x39   :  { %507 = vmatpush1.bf16.msra.mxu0 %v1816_v23 }
  0x3a   :  { %548 = vmatpush1.bf16.msra.mxu1 %v1817_v24  ;;  %508 = vmatprep.subr.bf16.mxu0 %v1818_v25 }
  0x3b   :  { %549 = vmatprep.subr.bf16.mxu1 %v1820_v26 }
  0x3d   :  { %509 = vmatpush1.bf16.msra.mxu0 %v1822_v27 }
  0x3e   :  { %550 = vmatpush1.bf16.msra.mxu1 %v1823_v28  ;;  %510 = vmatprep.subr.bf16.mxu0 %v1824_v29 }
  0x3f   :  { %551 = vmatprep.subr.bf16.mxu1 %v1826_v30 }
  0x41   :  { %511 = vmatpush1.bf16.msra.mxu0 %v1828_v31 }
  0x42   :  { %552 = vmatpush1.bf16.msra.mxu1 %v1829_v32  ;;  %512 = vmatprep.subr.bf16.mxu0 %v1830_v33 }
  0x43   :  { %553 = vmatprep.subr.bf16.mxu1 %v1832_v34 }
  0x45   :  { %513 = vmatpush1.bf16.msra.mxu0 %v1834_v35 }
  0x46   :  { %554 = vmatpush1.bf16.msra.mxu1 %v1835_v36  ;;  %1402 = vmatprep.subr.bf16.mxu0 %v1838_v37 }
  0x47   :  { %1484 = vmatprep.subr.bf16.mxu1 %v1841_v38 }
  0xac   :  { %v63_v40 = vpop.permute.xlu0 %62 }
  0xad   :  { %v2197_v41 = vmul.f32 %v1586_v39, %v63_v40 }
  0xaf   :  { %v78_v42 = vand.u32 2139095040, %v2197_v41  ;;  %v75_v46 = vand.u32 2147483647, %v2197_v41  ;;  %vm77_vm9 = vcmp.lt.s32.totalorder %v2197_v41, 0 }
  0xb1   :  { %v79_v43 = vshrl.u32 %v78_v42, 23  ;;  %v82_v49 = vand.u32 8388607, %v75_v46  ;;  %vm76_vm10 = vcmp.le.f32.partialorder %v75_v46, 0.7853982 }
  0xb3   :  { %v1587_v44 = vadd.s32 4294967169, %v79_v43  ;;  %v83_v4 = vor.u32 8388608, %v82_v49 }
  0xb5   :  { %v85_v45 = vadd.s32 1, %v1587_v44  ;;  %v123_v18 = vshll.u32 %v83_v4, 8 }
  0xb7   :  { %vm86_vm2 = vcmp.gt.s32.totalorder %v85_v45, 0 }
  0xb8   :  { %v87_v47 = vsel %vm86_vm2, %v85_v45, 0  ;;  %vm167_vm2 = vweird.f32 %v2197_v41 }
  0xb9   :  { %v89_v48 = vand.u32 31, %v87_v47  ;;  %v88_v51 = vshrl.u32 %v87_v47, 5 }
  0xbb   :  { %v90_v50 = vsub.s32 32, %v89_v48  ;;  %v92_v53 = vshll.u32 %v2125_v52, %v89_v48  ;;  %v95_v55 = vshll.u32 %v2126_v54, %v89_v48  ;;  %v98_v59 = vshll.u32 %v2127_v57, %v89_v48 }
  0xbc   :  { %v101_v62 = vshll.u32 %v2128_v60, %v89_v48  ;;  %v104_v1 = vshll.u32 %v2129_v63, %v89_v48  ;;  %vm107_vm3 = vcmp.lt.s32.totalorder %v88_v51, 1  ;;  %vm110_vm4 = vcmp.lt.s32.totalorder %v88_v51, 4 }
  0xbd   :  { %v93_v56 = vshrl.u32 %v2126_v54, %v90_v50  ;;  %v96_v58 = vshrl.u32 %v2127_v57, %v90_v50  ;;  %v99_v61 = vshrl.u32 %v2128_v60, %v90_v50  ;;  %v102_v0 = vshrl.u32 %v2129_v63, %v90_v50 }
  0xbe   :  { %v105_v3 = vshrl.u32 %v2130_v2, %v90_v50  ;;  %v91_v13 = vshrl.u32 %v2125_v52, %v90_v50  ;;  %vm109_vm5 = vcmp.lt.s32.totalorder %v88_v51, 3  ;;  %vm108_vm6 = vcmp.lt.s32.totalorder %v88_v51, 2 }
  0xbf   :  { %v94_v5 = vor.u32 %v93_v56, %v92_v53  ;;  %v97_v6 = vor.u32 %v96_v58, %v95_v55  ;;  %v100_v7 = vor.u32 %v99_v61, %v98_v59  ;;  %v103_v8 = vor.u32 %v102_v0, %v101_v62 }
  0xc0   :  { %v106_v9 = vor.u32 %v105_v3, %v104_v1  ;;  %v72_v61 = vlaneseq }
  0xc1   :  { %v112_v10 = vsel %vm110_vm4, %v100_v7, 2102212464  ;;  %v115_v11 = vsel %vm107_vm3, %v94_v5, %v97_v6  ;;  %v119_v12 = vsel %vm107_vm3, %v97_v6, %v100_v7  ;;  %v116_v14 = vsel %vm110_vm4, %v103_v8, 920167782 }
  0xc2   :  { %v120_v15 = vsel %vm110_vm4, %v106_v9, 1326507024  ;;  %v117_v16 = vsel %vm109_vm5, %v100_v7, %v116_v14  ;;  %v111_v19 = vsel %vm107_vm3, %v91_v13, %v94_v5  ;;  %v113_v20 = vsel %vm109_vm5, %v97_v6, %v112_v10  ;;  %v1836_v14 = vld [vmem:[#allocation5] ss:$16 sps:$4 sm:$0xff]  }
  0xc3   :  { %v121_v17 = vsel %vm109_vm5, %v103_v8, %v120_v15  ;;  %v118_v21 = vsel %vm108_vm6, %v115_v11, %v117_v16  ;;  %v114_v27 = vsel %vm108_vm6, %v111_v19, %v113_v20  ;;  %v73_v63 = vand.u32 127, %v72_v61  ;;  %v1839_v15 = vld [vmem:[#allocation5 + $0x8] ss:$16 sps:$4 sm:$0xff]   ;;  %v1842_v19 = vld [vmem:[#allocation5 + $0x20] ss:$16 sps:$4 sm:$0xff]  }
  0xc4   :  { %v122_v22 = vsel %vm108_vm6, %v119_v12, %v121_v17  ;;  %v2206_v25 = vmul.u32.u64.low %v123_v18, %v118_v21  ;;  %v2207_v26 = vmul.u32.u64.high %v123_v18, %v118_v21, %v2206_v25  ;;  %v130_v29 = vmul.u32 %v123_v18, %v114_v27  ;;  %v1844_v17 = vld [vmem:[#allocation5 + $0x24] ss:$16 sps:$4 sm:$0xff]   ;;  %v1845_v20 = vld [vmem:[#allocation5 + $0x28] ss:$16 sps:$4 sm:$0xff]   ;;  %v1853_v21 = vld [vmem:[#allocation5 + $0x4c] ss:$16 sps:$4 sm:$0xff]  }
  0xc5   :  { %v2203_v23 = vmul.u32.u64.low %v123_v18, %v122_v22  ;;  %v2204_v24 = vmul.u32.u64.high %v123_v18, %v122_v22, %v2203_v23  ;;  %vm74_vm11 = vcmp.lt.s32.totalorder %v73_v63, 64  ;;  %v1847_v18 = vld [vmem:[#allocation5 + $0x2c] ss:$16 sps:$4 sm:$0xff]   ;;  %v1848_v22 = vld [vmem:[#allocation5 + $0x40] ss:$16 sps:$4 sm:$0xff]  }
  0xc6   :  { %v133_v28 = vadd.s32 1, %v2207_v26  ;;  %v1851_v23 = vld [vmem:[#allocation5 + $0x48] ss:$16 sps:$4 sm:$0xff]   ;;  %v1910_v63 = vld [vmem:[#allocation5 + $0x184] ss:$16 sps:$4 sm:$0xff]  }
  0xc7   :  { %vm132_vm7 = vc.u32 %v2204_v24, %v2206_v25  ;;  %v131_v42 = vadd.s32 %v2206_v25, %v2204_v24  ;;  %v1856_v24 = vld [vmem:[#allocation5 + $0x64] ss:$16 sps:$4 sm:$0xff]   ;;  %v1859_v25 = vld [vmem:[#allocation5 + $0x6c] ss:$16 sps:$4 sm:$0xff]   ;;  %v1857_v27 = vld [vmem:[#allocation5 + $0x68] ss:$16 sps:$4 sm:$0xff]  }
  0xc8   :  { %v134_v30 = vsel %vm132_vm7, %v133_v28, %v2207_v26  ;;  %v1854_v26 = vld [vmem:[#allocation5 + $0x60] ss:$16 sps:$4 sm:$0xff]   ;;  %v1862_v28 = vld [vmem:[#allocation5 + $0x84] ss:$16 sps:$4 sm:$0xff]  }
  0xc9   :  { %v135_v31 = vadd.s32 %v134_v30, %v130_v29  ;;  %v1865_v29 = vld [vmem:[#allocation5 + $0x8c] ss:$16 sps:$4 sm:$0xff]   ;;  %v1860_v30 = vld [vmem:[#allocation5 + $0x80] ss:$16 sps:$4 sm:$0xff]  }
  0xcb   :  { %v136_v32 = vadd.s32 536870912, %v135_v31 }
  0xcd   :  { %v137_v33 = vshrl.u32 %v136_v32, 30  ;;  %v1868_v32 = vld [vmem:[#allocation5 + $0xa4] ss:$16 sps:$4 sm:$0xff]  }
  0xcf   :  { %v138_v34 = vshll.u32 %v137_v33, 30  ;;  %v161_v55 = vsub.s32 4, %v137_v33 }
  0xd1   :  { %v139_v35 = vsub.s32 %v135_v31, %v138_v34  ;;  %v162_v58 = vsel %vm77_vm9, %v161_v55, %v137_v33  ;;  %v1863_v31 = vld [vmem:[#allocation5 + $0x88] ss:$16 sps:$4 sm:$0xff]   ;;  %v1871_v33 = vld [vmem:[#allocation5 + $0xac] ss:$16 sps:$4 sm:$0xff]   ;;  %v1866_v34 = vld [vmem:[#allocation5 + $0xa0] ss:$16 sps:$4 sm:$0xff]  }
  0xd2   :  { %v164_v60 = vsel %vm76_vm10, 0, %v162_v58  ;;  %v1901_v55 = vld [vmem:[#allocation5 + $0x14c] ss:$16 sps:$4 sm:$0xff]   ;;  %v1904_v58 = vld [vmem:[#allocation5 + $0x164] ss:$16 sps:$4 sm:$0xff]  }
  0xd3   :  { %v141_v36 = vsub.s32 0, %v139_v35  ;;  %v168_v62 = vadd.s32 3, %v164_v60  ;;  %v272_v1 = vand.u32 3, %v164_v60  ;;  %v1902_v60 = vld [vmem:[#allocation5 + $0x160] ss:$16 sps:$4 sm:$0xff]  }
  0xd5   :  { %v1588_v37 = vmin.u32 %v141_v36, %v139_v35  ;;  %v169_v0 = vand.u32 3, %v168_v62  ;;  %vm277_vm13 = vcmp.eq.s32.totalorder %v272_v1, 2  ;;  %vm274_vm15 = vcmp.eq.s32.totalorder %v272_v1, 0  ;;  %v1874_v36 = vld [vmem:[#allocation5 + $0xc4] ss:$16 sps:$4 sm:$0xff]  }
  0xd6   :  { %vm273_vm1 = vcmp.lt.s32.totalorder %v272_v1, 2  ;;  %v1905_v62 = vld [vmem:[#allocation5 + $0x168] ss:$16 sps:$4 sm:$0xff]   ;;  %v1908_v1 = vld [vmem:[#allocation5 + $0x180] ss:$16 sps:$4 sm:$0xff]  }
  0xd7   :  { %v143_v38 = vclz %v1588_v37  ;;  %vm174_vm12 = vcmp.eq.s32.totalorder %v169_v0, 2  ;;  %vm171_vm14 = vcmp.eq.s32.totalorder %v169_v0, 0  ;;  %vm170_vm0 = vcmp.lt.s32.totalorder %v169_v0, 2  ;;  %v1877_v37 = vld [vmem:[#allocation5 + $0xcc] ss:$16 sps:$4 sm:$0xff]  }
  0xd8   :  { %v1913_v0 = vld [vmem:[#allocation5 + $0x18c] ss:$16 sps:$4 sm:$0xff]  }
  0xd9   :  { %v1589_v39 = vadd.s32 4294967294, %v143_v38  ;;  %v1872_v38 = vld [vmem:[#allocation5 + $0xc0] ss:$16 sps:$4 sm:$0xff]  }
  0xdb   :  { %vm1590_vm8 = vcmp.lt.s32.totalorder %v1589_v39, 0 }
  0xdc   :  { %v146_v40 = vsel %vm1590_vm8, 0, %v1589_v39  ;;  %v1875_v39 = vld [vmem:[#allocation5 + $0xc8] ss:$16 sps:$4 sm:$0xff]  }
  0xdd   :  { %v147_v43 = vsub.s32 32, %v146_v40  ;;  %v151_v44 = vsub.s32 4294967266, %v146_v40  ;;  %v148_v45 = vshll.u32 %v139_v35, %v146_v40  ;;  %v1869_v35 = vld [vmem:[#allocation5 + $0xa8] ss:$16 sps:$4 sm:$0xff]   ;;  %v1880_v40 = vld [vmem:[#allocation5 + $0xe4] ss:$16 sps:$4 sm:$0xff]  }
  0xdf   :  { %v149_v47 = vshrl.u32 %v131_v42, %v147_v43  ;;  %v152_v48 = vadd.s32 127, %v151_v44  ;;  %v1883_v42 = vld [vmem:[#allocation5 + $0xec] ss:$16 sps:$4 sm:$0xff]   ;;  %v1878_v43 = vld [vmem:[#allocation5 + $0xe0] ss:$16 sps:$4 sm:$0xff]  }
  0xe0   :  { %v1881_v44 = vld [vmem:[#allocation5 + $0xe8] ss:$16 sps:$4 sm:$0xff]  }
  0xe1   :  { %v150_v49 = vor.u32 %v149_v47, %v148_v45  ;;  %v153_v50 = vshll.u32 %v152_v48, 23  ;;  %v1886_v45 = vld [vmem:[#allocation5 + $0x104] ss:$16 sps:$4 sm:$0xff]   ;;  %v1889_v47 = vld [vmem:[#allocation5 + $0x10c] ss:$16 sps:$4 sm:$0xff]  }
  0xe2   :  { %v1884_v48 = vld [vmem:[#allocation5 + $0x100] ss:$16 sps:$4 sm:$0xff]  }
  0xe3   :  { %v154_v51 = vor.u32 4788187, %v153_v50  ;;  %v157_v53 = vcvt.s32.f32 %v150_v49  ;;  %v1887_v49 = vld [vmem:[#allocation5 + $0x108] ss:$16 sps:$4 sm:$0xff]   ;;  %v1892_v50 = vld [vmem:[#allocation5 + $0x124] ss:$16 sps:$4 sm:$0xff]  }
  0xe5   :  { %v155_v52 = vand.u32 2147483647, %v154_v51  ;;  %v1895_v51 = vld [vmem:[#allocation5 + $0x12c] ss:$16 sps:$4 sm:$0xff]  }
  0xe7   :  { %v158_v54 = vmul.f32 %v157_v53, %v155_v52  ;;  %v1890_v52 = vld [vmem:[#allocation5 + $0x120] ss:$16 sps:$4 sm:$0xff]   ;;  %v1893_v53 = vld [vmem:[#allocation5 + $0x128] ss:$16 sps:$4 sm:$0xff]  }
  0xe9   :  { %v159_v56 = vxor.u32 2147483648, %v158_v54 }
  0xeb   :  { %v160_v57 = vsel %vm77_vm9, %v159_v56, %v158_v54  ;;  %v1898_v54 = vld [vmem:[#allocation5 + $0x144] ss:$16 sps:$4 sm:$0xff]   ;;  %v1896_v56 = vld [vmem:[#allocation5 + $0x140] ss:$16 sps:$4 sm:$0xff]  }
  0xec   :  { %v163_v59 = vsel %vm76_vm10, %v2197_v41, %v160_v57  ;;  %v1850_v41 = vld [vmem:[#allocation5 + $0x44] ss:$16 sps:$4 sm:$0xff]   ;;  %v1899_v57 = vld [vmem:[#allocation5 + $0x148] ss:$16 sps:$4 sm:$0xff]  }
  0xed   :  { %2028 = vcosq.f32 %v163_v59 }
  0xee   :  { %2030 = vsinq.f32 %v163_v59  ;;  %v1907_v59 = vld [vmem:[#allocation5 + $0x16c] ss:$16 sps:$4 sm:$0xff]  }
  0xf7   :  { %v2029_v2 = vpop.eup %2028 }
  0xf8   :  { %v2031_v3 = vpop.eup %2030  ;;  %v175_v4 = vxor.u32 2147483648, %v2029_v2 }
  0xf9   :  { %v172_v5 = vxor.u32 2147483648, %v2031_v3 }
  0xfa   :  { %v176_v46 = vsel %vm174_vm12, %v175_v4, %v2031_v3  ;;  %v279_v6 = vsel %vm277_vm13, %v175_v4, %v2031_v3  ;;  %v1916_v3 = vld [vmem:[#allocation5 + $0x1a4] ss:$16 sps:$4 sm:$0xff]   ;;  %v1919_v4 = vld [vmem:[#allocation5 + $0x1ac] ss:$16 sps:$4 sm:$0xff]  }
  0xfb   :  { %v173_v7 = vsel %vm171_vm14, %v2029_v2, %v172_v5  ;;  %v276_v8 = vsel %vm274_vm15, %v2029_v2, %v172_v5  ;;  %v1911_v2 = vld [vmem:[#allocation5 + $0x188] ss:$16 sps:$4 sm:$0xff]   ;;  %v1914_v5 = vld [vmem:[#allocation5 + $0x1a0] ss:$16 sps:$4 sm:$0xff]  }
  0xfc   :  { %v177_v9 = vsel %vm170_vm0, %v173_v7, %v176_v46  ;;  %v280_v10 = vsel %vm273_vm1, %v276_v8, %v279_v6  ;;  %v1917_v46 = vld [vmem:[#allocation5 + $0x1a8] ss:$16 sps:$4 sm:$0xff]   ;;  %v1922_v6 = vld [vmem:[#allocation5 + $0x1c4] ss:$16 sps:$4 sm:$0xff]   ;;  %v1925_v7 = vld [vmem:[#allocation5 + $0x1cc] ss:$16 sps:$4 sm:$0xff]  }
  0xfd   :  { %v178_v11 = vsel %vm167_vm2, nan, %v177_v9  ;;  %v281_v12 = vsel %vm167_vm2, nan, %v280_v10  ;;  %v1920_v8 = vld [vmem:[#allocation5 + $0x1c0] ss:$16 sps:$4 sm:$0xff]   ;;  %v1923_v9 = vld [vmem:[#allocation5 + $0x1c8] ss:$16 sps:$4 sm:$0xff]  }
  0xfe   :  { %v282_v13 = vsel %vm74_vm11, %v178_v11, %v281_v12  ;;  %v1928_v10 = vld [vmem:[#allocation5 + $0x1e4] ss:$16 sps:$4 sm:$0xff]   ;;  %v1931_v11 = vld [vmem:[#allocation5 + $0x1ec] ss:$16 sps:$4 sm:$0xff]   ;;  %v1926_v12 = vld [vmem:[#allocation5 + $0x1e0] ss:$16 sps:$4 sm:$0xff]  }
  0xff   :  { %v283_v16 = vpack.c.bf16 %v282_v13, %v282_v13  ;;  %v1929_v13 = vld [vmem:[#allocation5 + $0x1e8] ss:$16 sps:$4 sm:$0xff]  }
 0x101   :  { %531 = vmatmul.mubr.bf16.vlgmr.msra.gmra.mrb[0].mxu0 %v283_v16  ;;  %572 = vmatmul.mubr.bf16.vlgmr.msra.gmra.mrb[0].mxu1 %v283_v16  ;;  %v2221_v16 = vshrl.u32 %v72_v61, 7 }
 0x102   :  { %1403 = vmatpush1.bf16.msra.mxu0 %v1836_v14  ;;  %1485 = vmatpush1.bf16.msra.mxu1 %v1839_v15  ;;  %v1934_v14 = vld [vmem:[#allocation5 + $0x204] ss:$16 sps:$4 sm:$0xff]   ;;  %v1937_v15 = vld [vmem:[#allocation5 + $0x20c] ss:$16 sps:$4 sm:$0xff]  }
 0x103   :  { %1404 = vmatprep.subr.bf16.mxu0 %v1844_v17  ;;  %1486 = vmatprep.subr.bf16.mxu1 %v1847_v18  ;;  %v320_v17 = vsub.s32 0, %v2221_v16  ;;  %v2227_v18 = vld [vmem:[%s2277_s3] sm:$0xf] }
 0x106   :  { %1405 = vmatpush1.bf16.msra.mxu0 %v1842_v19  ;;  %1487 = vmatpush1.bf16.msra.mxu1 %v1845_v20  ;;  %v324_v19 = vsub.s32 1, %v2221_v16  ;;  %v332_v20 = vsub.s32 3, %v2221_v16 }
 0x107   :  { %1406 = vmatprep.subr.bf16.mxu0 %v1850_v41  ;;  %1488 = vmatprep.subr.bf16.mxu1 %v1853_v21  ;;  %v321_v41 = vrot.slane %v2227_v18, %v320_v17 }
 0x108   :  { %v325_v61 = vrot.slane %v2227_v18, %v324_v19  ;;  %v333_v21 = vrot.slane %v2227_v18, %v332_v20 }
 0x10a   :  { %1407 = vmatpush1.bf16.msra.mxu0 %v1848_v22  ;;  %1489 = vmatpush1.bf16.msra.mxu1 %v1851_v23 }
 0x10b   :  { %1408 = vmatprep.subr.bf16.mxu0 %v1856_v24  ;;  %1490 = vmatprep.subr.bf16.mxu1 %v1859_v25 }
 0x10e   :  { %1409 = vmatpush1.bf16.msra.mxu0 %v1854_v26  ;;  %1491 = vmatpush1.bf16.msra.mxu1 %v1857_v27 }
 0x10f   :  { %1410 = vmatprep.subr.bf16.mxu0 %v1862_v28  ;;  %1492 = vmatprep.subr.bf16.mxu1 %v1865_v29 }
 0x112   :  { %1411 = vmatpush1.bf16.msra.mxu0 %v1860_v30  ;;  %1493 = vmatpush1.bf16.msra.mxu1 %v1863_v31 }
 0x113   :  { %1412 = vmatprep.subr.bf16.mxu0 %v1868_v32  ;;  %1494 = vmatprep.subr.bf16.mxu1 %v1871_v33 }
 0x116   :  { %1413 = vmatpush1.bf16.msra.mxu0 %v1866_v34  ;;  %1495 = vmatpush1.bf16.msra.mxu1 %v1869_v35 }
 0x117   :  { %1414 = vmatprep.subr.bf16.mxu0 %v1874_v36  ;;  %1496 = vmatprep.subr.bf16.mxu1 %v1877_v37 }
 0x11a   :  { %1415 = vmatpush1.bf16.msra.mxu0 %v1872_v38  ;;  %1497 = vmatpush1.bf16.msra.mxu1 %v1875_v39 }
 0x11b   :  { %1416 = vmatprep.subr.bf16.mxu0 %v1880_v40  ;;  %1498 = vmatprep.subr.bf16.mxu1 %v1883_v42 }
 0x11e   :  { %1417 = vmatpush1.bf16.msra.mxu0 %v1878_v43  ;;  %1499 = vmatpush1.bf16.msra.mxu1 %v1881_v44 }
 0x11f   :  { %1418 = vmatprep.subr.bf16.mxu0 %v1886_v45  ;;  %1500 = vmatprep.subr.bf16.mxu1 %v1889_v47 }
 0x122   :  { %1419 = vmatpush1.bf16.msra.mxu0 %v1884_v48  ;;  %1501 = vmatpush1.bf16.msra.mxu1 %v1887_v49 }
 0x123   :  { %1420 = vmatprep.subr.bf16.mxu0 %v1892_v50  ;;  %1502 = vmatprep.subr.bf16.mxu1 %v1895_v51  ;;  %v1932_v51 = vld [vmem:[#allocation5 + $0x200] ss:$16 sps:$4 sm:$0xff]  }
 0x126   :  { %1421 = vmatpush1.bf16.msra.mxu0 %v1890_v52  ;;  %1503 = vmatpush1.bf16.msra.mxu1 %v1893_v53  ;;  %v1935_v52 = vld [vmem:[#allocation5 + $0x208] ss:$16 sps:$4 sm:$0xff]  }
 0x127   :  { %1422 = vmatprep.subr.bf16.mxu0 %v1898_v54  ;;  %1504 = vmatprep.subr.bf16.mxu1 %v1901_v55  ;;  %v1940_v54 = vld [vmem:[#allocation5 + $0x224] ss:$16 sps:$4 sm:$0xff]   ;;  %v1943_v55 = vld [vmem:[#allocation5 + $0x22c] ss:$16 sps:$4 sm:$0xff]  }
 0x12a   :  { %1423 = vmatpush1.bf16.msra.mxu0 %v1896_v56  ;;  %1505 = vmatpush1.bf16.msra.mxu1 %v1899_v57  ;;  %v1938_v57 = vld [vmem:[#allocation5 + $0x220] ss:$16 sps:$4 sm:$0xff]  }
 0x12b   :  { %1424 = vmatprep.subr.bf16.mxu0 %v1904_v58  ;;  %1506 = vmatprep.subr.bf16.mxu1 %v1907_v59  ;;  %v1941_v58 = vld [vmem:[#allocation5 + $0x228] ss:$16 sps:$4 sm:$0xff]   ;;  %v1946_v59 = vld [vmem:[#allocation5 + $0x244] ss:$16 sps:$4 sm:$0xff]  }
 0x12e   :  { %1425 = vmatpush1.bf16.msra.mxu0 %v1902_v60  ;;  %1507 = vmatpush1.bf16.msra.mxu1 %v1905_v62  ;;  %v1949_v60 = vld [vmem:[#allocation5 + $0x24c] ss:$16 sps:$4 sm:$0xff]   ;;  %v1944_v62 = vld [vmem:[#allocation5 + $0x240] ss:$16 sps:$4 sm:$0xff]  }
 0x12f   :  { %1426 = vmatprep.subr.bf16.mxu0 %v1910_v63  ;;  %1508 = vmatprep.subr.bf16.mxu1 %v1913_v0  ;;  %v1947_v63 = vld [vmem:[#allocation5 + $0x248] ss:$16 sps:$4 sm:$0xff]   ;;  %v1952_v0 = vld [vmem:[#allocation5 + $0x264] ss:$16 sps:$4 sm:$0xff]  }
 0x132   :  { %1427 = vmatpush1.bf16.msra.mxu0 %v1908_v1  ;;  %1509 = vmatpush1.bf16.msra.mxu1 %v1911_v2  ;;  %v1955_v1 = vld [vmem:[#allocation5 + $0x26c] ss:$16 sps:$4 sm:$0xff]   ;;  %v1950_v2 = vld [vmem:[#allocation5 + $0x260] ss:$16 sps:$4 sm:$0xff]  }
 0x133   :  { %1428 = vmatprep.subr.bf16.mxu0 %v1916_v3  ;;  %1510 = vmatprep.subr.bf16.mxu1 %v1919_v4  ;;  %v1953_v3 = vld [vmem:[#allocation5 + $0x268] ss:$16 sps:$4 sm:$0xff]   ;;  %v1958_v4 = vld [vmem:[#allocation5 + $0x284] ss:$16 sps:$4 sm:$0xff]  }
 0x136   :  { %1429 = vmatpush1.bf16.msra.mxu0 %v1914_v5  ;;  %1511 = vmatpush1.bf16.msra.mxu1 %v1917_v46  ;;  %v1961_v5 = vld [vmem:[#allocation5 + $0x28c] ss:$16 sps:$4 sm:$0xff]   ;;  %v328_v46 = vsub.s32 2, %v2221_v16 }
 0x137   :  { %1430 = vmatprep.subr.bf16.mxu0 %v1922_v6  ;;  %1512 = vmatprep.subr.bf16.mxu1 %v1925_v7  ;;  %v1956_v6 = vld [vmem:[#allocation5 + $0x280] ss:$16 sps:$4 sm:$0xff]   ;;  %v1959_v7 = vld [vmem:[#allocation5 + $0x288] ss:$16 sps:$4 sm:$0xff]  }
 0x13a   :  { %1431 = vmatpush1.bf16.msra.mxu0 %v1920_v8  ;;  %1513 = vmatpush1.bf16.msra.mxu1 %v1923_v9  ;;  %v1964_v8 = vld [vmem:[#allocation5 + $0x2a4] ss:$16 sps:$4 sm:$0xff]   ;;  %v1967_v9 = vld [vmem:[#allocation5 + $0x2ac] ss:$16 sps:$4 sm:$0xff]  }
 0x13b   :  { %1432 = vmatprep.subr.bf16.mxu0 %v1928_v10  ;;  %1514 = vmatprep.subr.bf16.mxu1 %v1931_v11  ;;  %v329_v10 = vrot.slane %v2227_v18, %v328_v46  ;;  %v1962_v11 = vld [vmem:[#allocation5 + $0x2a0] ss:$16 sps:$4 sm:$0xff]  }
 0x13e   :  { %1433 = vmatpush1.bf16.msra.mxu0 %v1926_v12  ;;  %1515 = vmatpush1.bf16.msra.mxu1 %v1929_v13  ;;  %v1965_v12 = vld [vmem:[#allocation5 + $0x2a8] ss:$16 sps:$4 sm:$0xff]   ;;  %v1970_v13 = vld [vmem:[#allocation5 + $0x2c4] ss:$16 sps:$4 sm:$0xff]  }
 0x13f   :  { %1443 = vmatprep.subr.bf16.mxu0 %v1934_v14  ;;  %1525 = vmatprep.subr.bf16.mxu1 %v1937_v15  ;;  %v1973_v14 = vld [vmem:[#allocation5 + $0x2cc] ss:$16 sps:$4 sm:$0xff]  }
 0x1d4   :  { %v532_v22 = vpop.f32.mrb[0].mxu0  ;;  %v2240_v23 = vpop.f32.mrb[0].mxu1 }
 0x1d5   :  { %v533_v24 = vadd.f32 %v532_v22, %v321_v41  ;;  %v534_v25 = vpop.f32.mrb[1].mxu0  ;;  %v575_v26 = vpop.f32.mrb[1].mxu1  ;;  %v2247_v15 = vadd.f32 %v2240_v23, %v329_v10  ;;  %v1968_v41 = vld [vmem:[#allocation5 + $0x2c0] ss:$16 sps:$4 sm:$0xff]   ;;  %v1979_v22 = vld [vmem:[#allocation5 + $0x2ec] ss:$16 sps:$4 sm:$0xff]  }
 0x1d6   :  { %v535_v27 = vadd.f32 %v534_v25, %v325_v61  ;;  %v576_v28 = vadd.f32 %v575_v26, %v333_v21  ;;  %v536_v29 = vpop.f32.mrb[2].mxu0  ;;  %v577_v30 = vpop.f32.mrb[2].mxu1  ;;  %v1971_v61 = vld [vmem:[#allocation5 + $0x2c8] ss:$16 sps:$4 sm:$0xff]   ;;  %v1976_v21 = vld [vmem:[#allocation5 + $0x2e4] ss:$16 sps:$4 sm:$0xff]  }
 0x1d7   :  { %v1627_v31 = vmul.f32 -1.442695, %v533_v24  ;;  %v537_v32 = vpop.f32.mrb[3].mxu0  ;;  %v578_v33 = vpop.f32.mrb[3].mxu1  ;;  %v1629_v18 = vmul.f32 -1.442695, %v2247_v15 }
 0x1d8   :  { %v1628_v34 = vmul.f32 -1.442695, %v535_v27  ;;  %v1630_v35 = vmul.f32 -1.442695, %v576_v28  ;;  %v1977_v25 = vld [vmem:[#allocation5 + $0x2e8] ss:$16 sps:$4 sm:$0xff]  }
 0x1d9   :  { %2032 = vpow2.f32 %v1627_v31  ;;  %v1982_v26 = vld [vmem:[#allocation5 + $0x304] ss:$16 sps:$4 sm:$0xff]   ;;  %v1980_v23 = vld [vmem:[#allocation5 + $0x300] ss:$16 sps:$4 sm:$0xff]   ;;  %v1991_v30 = vld [vmem:[#allocation5 + $0x32c] ss:$16 sps:$4 sm:$0xff]  }
 0x1da   :  { %2034 = vpow2.f32 %v1628_v34  ;;  %v1988_v29 = vld [vmem:[#allocation5 + $0x324] ss:$16 sps:$4 sm:$0xff]   ;;  %v1986_v31 = vld [vmem:[#allocation5 + $0x320] ss:$16 sps:$4 sm:$0xff]   ;;  %v1989_v32 = vld [vmem:[#allocation5 + $0x328] ss:$16 sps:$4 sm:$0xff]  }
 0x1db   :  { %2036 = vpow2.f32 %v1630_v35  ;;  %v1994_v33 = vld [vmem:[#allocation5 + $0x344] ss:$16 sps:$4 sm:$0xff]   ;;  %v1997_v34 = vld [vmem:[#allocation5 + $0x34c] ss:$16 sps:$4 sm:$0xff]   ;;  %v1992_v35 = vld [vmem:[#allocation5 + $0x340] ss:$16 sps:$4 sm:$0xff]  }
 0x1e3   :  { %v2033_v36 = vpop.eup %2032 }
 0x1e4   :  { %v592_v37 = vadd.f32 1.0, %v2033_v36  ;;  %v2035_v38 = vpop.eup %2034  ;;  %v1995_v36 = vld [vmem:[#allocation5 + $0x348] ss:$16 sps:$4 sm:$0xff]  }
 0x1e5   :  { %v2037_v39 = vpop.eup %2036  ;;  %v593_v40 = vadd.f32 1.0, %v2035_v38  ;;  %v2000_v38 = vld [vmem:[#allocation5 + $0x364] ss:$16 sps:$4 sm:$0xff]  }
 0x1e6   :  { %2038 = vrcp.f32 %v592_v37  ;;  %v595_v42 = vadd.f32 1.0, %v2037_v39  ;;  %v2003_v39 = vld [vmem:[#allocation5 + $0x36c] ss:$16 sps:$4 sm:$0xff]  }
 0x1e7   :  { %2040 = vrcp.f32 %v593_v40 }
 0x1e8   :  { %2042 = vrcp.f32 %v595_v42  ;;  %v1998_v42 = vld [vmem:[#allocation5 + $0x360] ss:$16 sps:$4 sm:$0xff]  }
 0x1e9   :  { %2044 = vpow2.f32 %v1629_v18 }
 0x1f0   :  { %v2039_v43 = vpop.eup %2038 }
 0x1f1   :  { %v2041_v44 = vpop.eup %2040  ;;  %v604_v45 = vmul.f32 %v2039_v43, %v533_v24  ;;  %v1974_v24 = vld [vmem:[#allocation5 + $0x2e0] ss:$16 sps:$4 sm:$0xff]   ;;  %v2001_v43 = vld [vmem:[#allocation5 + $0x368] ss:$16 sps:$4 sm:$0xff]  }
 0x1f2   :  { %v2043_v47 = vpop.eup %2042  ;;  %v605_v48 = vmul.f32 %v2041_v44, %v535_v27  ;;  %v1985_v27 = vld [vmem:[#allocation5 + $0x30c] ss:$16 sps:$4 sm:$0xff]   ;;  %v2006_v44 = vld [vmem:[#allocation5 + $0x384] ss:$16 sps:$4 sm:$0xff]  }
 0x1f3   :  { %v607_v49 = vmul.f32 %v2043_v47, %v576_v28  ;;  %v608_v53 = vpack.c.bf16 %v604_v45, %v604_v45  ;;  %v1983_v28 = vld [vmem:[#allocation5 + $0x308] ss:$16 sps:$4 sm:$0xff]   ;;  %v2045_v37 = vpop.eup %2044  ;;  %v2009_v45 = vld [vmem:[#allocation5 + $0x38c] ss:$16 sps:$4 sm:$0xff]   ;;  %v2004_v47 = vld [vmem:[#allocation5 + $0x380] ss:$16 sps:$4 sm:$0xff]  }
 0x1f4   :  { %v609_v50 = vpack.c.bf16 %v605_v48, %v605_v48  ;;  %v594_v40 = vadd.f32 1.0, %v2045_v37  ;;  %v2007_v48 = vld [vmem:[#allocation5 + $0x388] ss:$16 sps:$4 sm:$0xff]  }
 0x1f5   :  { %v611_v56 = vpack.c.bf16 %v607_v49, %v607_v49  ;;  %v2012_v49 = vld [vmem:[#allocation5 + $0x3a4] ss:$16 sps:$4 sm:$0xff]  }
 0x1f6   :  { %1434 = vmatprep.mubr.bf16.mxu0 %v609_v50  ;;  %1516 = vmatprep.mubr.bf16.mxu1 %v609_v50  ;;  %2046 = vrcp.f32 %v594_v40  ;;  %v2015_v50 = vld [vmem:[#allocation5 + $0x3ac] ss:$16 sps:$4 sm:$0xff]  }
 0x1f7   :  { %1435 = vmatmul.mubr.bf16.vlgmr.msra.gmra.mrb[4].mxu0 %v608_v53  ;;  %1517 = vmatmul.mubr.bf16.vlgmr.msra.gmra.mrb[4].mxu1 %v608_v53  ;;  %v2018_v53 = vld [vmem:[#allocation5 + $0x3c4] ss:$16 sps:$4 sm:$0xff]  }
 0x1f8   :  { %1444 = vmatpush1.bf16.msra.mxu0 %v1932_v51  ;;  %1526 = vmatpush1.bf16.msra.mxu1 %v1935_v52  ;;  %v2010_v51 = vld [vmem:[#allocation5 + $0x3a0] ss:$16 sps:$4 sm:$0xff]   ;;  %v2013_v52 = vld [vmem:[#allocation5 + $0x3a8] ss:$16 sps:$4 sm:$0xff]  }
 0x1f9   :  { %1475 = vmatprep.mubr.bf16.mxu0 %v611_v56  ;;  %1557 = vmatprep.mubr.bf16.mxu1 %v611_v56  ;;  %v2019_v56 = vld [vmem:[#allocation5 + $0x3c8] ss:$16 sps:$4 sm:$0xff]  }
 0x1fa   :  { %1445 = vmatprep.subr.bf16.mxu0 %v1940_v54  ;;  %1527 = vmatprep.subr.bf16.mxu1 %v1943_v55  ;;  %v2021_v54 = vld [vmem:[#allocation5 + $0x3cc] ss:$16 sps:$4 sm:$0xff]   ;;  %v2016_v55 = vld [vmem:[#allocation5 + $0x3c0] ss:$16 sps:$4 sm:$0xff]  }
 0x1fc   :  { %1446 = vmatpush1.bf16.msra.mxu0 %v1938_v57  ;;  %1528 = vmatpush1.bf16.msra.mxu1 %v1941_v58  ;;  %v2024_v57 = vld [vmem:[#allocation5 + $0x3e4] ss:$16 sps:$4 sm:$0xff]   ;;  %v2027_v58 = vld [vmem:[#allocation5 + $0x3ec] ss:$16 sps:$4 sm:$0xff]  }
 0x1fd   :  { %1447 = vmatprep.subr.bf16.mxu0 %v1946_v59  ;;  %1529 = vmatprep.subr.bf16.mxu1 %v1949_v60  ;;  %v2022_v60 = vld [vmem:[#allocation5 + $0x3e0] ss:$16 sps:$4 sm:$0xff]  }
 0x200   :  { %1448 = vmatpush1.bf16.msra.mxu0 %v1944_v62  ;;  %1530 = vmatpush1.bf16.msra.mxu1 %v1947_v63  ;;  %v2047_v59 = vpop.eup %2046  ;;  %v2025_v62 = vld [vmem:[#allocation5 + $0x3e8] ss:$16 sps:$4 sm:$0xff]  }
 0x201   :  { %1449 = vmatprep.subr.bf16.mxu0 %v1952_v0  ;;  %1531 = vmatprep.subr.bf16.mxu1 %v1955_v1  ;;  %v606_v63 = vmul.f32 %v2047_v59, %v2247_v15  ;;  %v740_v1 = vld [vmem:[%s2279_s5] sm:$0xf]  ;;  %s2092_s5 = scalar_lea.vmem %s1577_s27, 512 }
 0x202   :  { %p2093_p2 = scmp.ne.s32.totalorder %s1577_s27, %s2092_s5  ;;  %p2098_p4 = scmp.lt.s32.totalorder %s2092_s5, %s2092_s5 }
 0x203   :  { %v610_v0 = vpack.c.bf16 %v606_v63, %v606_v63 }
 0x204   :  { %1450 = vmatpush1.bf16.msra.mxu0 %v1950_v2  ;;  %1532 = vmatpush1.bf16.msra.mxu1 %v1953_v3  ;;  %v745_v2 = vrot.slane %v740_v1, %v320_v17  ;;  %v753_v3 = vrot.slane %v740_v1, %v328_v46  ;;  %p2099_p5 = por %p2098_p4, %p2097_p3 }
 0x205   :  { %1451 = vmatprep.subr.bf16.mxu0 %v1958_v4  ;;  %1533 = vmatprep.subr.bf16.mxu1 %v1961_v5  ;;  %v749_v4 = vrot.slane %v740_v1, %v324_v19  ;;  %v757_v5 = vrot.slane %v740_v1, %v332_v20 }
 0x206   :  { %p2100_p6 = pnand %p2099_p5, %p2093_p2 }
 0x208   :  { %1452 = vmatpush1.bf16.msra.mxu0 %v1956_v6  ;;  %1534 = vmatpush1.bf16.msra.mxu1 %v1959_v7 }
 0x209   :  { %1453 = vmatprep.subr.bf16.mxu0 %v1964_v8  ;;  %1535 = vmatprep.subr.bf16.mxu1 %v1967_v9 }
 0x20c   :  { %1454 = vmatpush1.bf16.msra.mxu0 %v1962_v11  ;;  %1536 = vmatpush1.bf16.msra.mxu1 %v1965_v12 }
 0x20d   :  { %1455 = vmatprep.subr.bf16.mxu0 %v1970_v13  ;;  %1537 = vmatprep.subr.bf16.mxu1 %v1973_v14 }
 0x210   :  { %1456 = vmatpush1.bf16.msra.mxu0 %v1968_v41  ;;  %1538 = vmatpush1.bf16.msra.mxu1 %v1971_v61 }
 0x211   :  { %1457 = vmatprep.subr.bf16.mxu0 %v1976_v21  ;;  %1539 = vmatprep.subr.bf16.mxu1 %v1979_v22 }
 0x214   :  { %1458 = vmatpush1.bf16.msra.mxu0 %v1974_v24  ;;  %1540 = vmatpush1.bf16.msra.mxu1 %v1977_v25 }
 0x215   :  { %1459 = vmatprep.subr.bf16.mxu0 %v1982_v26  ;;  %1541 = vmatprep.subr.bf16.mxu1 %v1985_v27 }
 0x218   :  { %1460 = vmatpush1.bf16.msra.mxu0 %v1980_v23  ;;  %1542 = vmatpush1.bf16.msra.mxu1 %v1983_v28 }
 0x219   :  { %1461 = vmatprep.subr.bf16.mxu0 %v1988_v29  ;;  %1543 = vmatprep.subr.bf16.mxu1 %v1991_v30 }
 0x21c   :  { %1462 = vmatpush1.bf16.msra.mxu0 %v1986_v31  ;;  %1544 = vmatpush1.bf16.msra.mxu1 %v1989_v32 }
 0x21d   :  { %1463 = vmatprep.subr.bf16.mxu0 %v1994_v33  ;;  %1545 = vmatprep.subr.bf16.mxu1 %v1997_v34 }
 0x220   :  { %1464 = vmatpush1.bf16.msra.mxu0 %v1992_v35  ;;  %1546 = vmatpush1.bf16.msra.mxu1 %v1995_v36 }
 0x221   :  { %1465 = vmatprep.subr.bf16.mxu0 %v2000_v38  ;;  %1547 = vmatprep.subr.bf16.mxu1 %v2003_v39 }
 0x224   :  { %1466 = vmatpush1.bf16.msra.mxu0 %v1998_v42  ;;  %1548 = vmatpush1.bf16.msra.mxu1 %v2001_v43 }
 0x225   :  { %1467 = vmatprep.subr.bf16.mxu0 %v2006_v44  ;;  %1549 = vmatprep.subr.bf16.mxu1 %v2009_v45 }
 0x228   :  { %1468 = vmatpush1.bf16.msra.mxu0 %v2004_v47  ;;  %1550 = vmatpush1.bf16.msra.mxu1 %v2007_v48 }
 0x229   :  { %1469 = vmatprep.subr.bf16.mxu0 %v2012_v49  ;;  %1551 = vmatprep.subr.bf16.mxu1 %v2015_v50 }
 0x22c   :  { %1470 = vmatpush1.bf16.msra.mxu0 %v2010_v51  ;;  %1552 = vmatpush1.bf16.msra.mxu1 %v2013_v52 }
 0x22d   :  { %1471 = vmatprep.subr.bf16.mxu0 %v2018_v53  ;;  %1553 = vmatprep.subr.bf16.mxu1 %v2021_v54 }
 0x230   :  { %1472 = vmatpush1.bf16.msra.mxu0 %v2016_v55  ;;  %1554 = vmatpush1.bf16.msra.mxu1 %v2019_v56 }
 0x231   :  { %1473 = vmatprep.subr.bf16.mxu0 %v2024_v57  ;;  %1555 = vmatprep.subr.bf16.mxu1 %v2027_v58 }
 0x234   :  { %1474 = vmatpush1.bf16.msra.mxu0 %v2022_v60  ;;  %1556 = vmatpush1.bf16.msra.mxu1 %v2025_v62 }
 0x237   :  { %1476 = vmatmul.mubr.bf16.vlgmr.msra.gmra.mrb[4].mxu0 %v610_v0  ;;  %1558 = vmatmul.mubr.bf16.vlgmr.msra.gmra.mrb[4].mxu1 %v610_v0 }
 0x30a   :  { %v1477_v6 = vpop.f32.mrb[4].mxu0  ;;  %v1559_v7 = vpop.f32.mrb[4].mxu1 }
 0x30b   :  { %v1759_v8 = vadd.f32 %v1477_v6, %v745_v2  ;;  %v1761_v9 = vadd.f32 %v1559_v7, %v753_v3  ;;  %v1479_v10 = vpop.f32.mrb[5].mxu0  ;;  %v1561_v11 = vpop.f32.mrb[5].mxu1 }
 0x30c   :  { %v1760_v12 = vadd.f32 %v1479_v10, %v749_v4  ;;  %v1762_v13 = vadd.f32 %v1561_v11, %v757_v5  ;;  %v1481_v17 = vpop.f32.mrb[6].mxu0  ;;  %v1563_v14 = vpop.f32.mrb[6].mxu1 }
 0x30d   :  { %1566 = vst [vmem:[#allocation7] sm:$0xff] %v1759_v8  ;;  %1568 = vst [vmem:[#allocation7 + $0x10] sm:$0xff] %v1761_v9  ;;  %v1482_v46 = vpop.f32.mrb[7].mxu0  ;;  %v1564_v19 = vpop.f32.mrb[7].mxu1 }
 0x30e   :  { %1567 = vst [vmem:[#allocation7 + $0x8] sm:$0xff] %v1760_v12  ;;  %1569 = vst [vmem:[#allocation7 + $0x18] sm:$0xff] %v1762_v13 }
 0x30f   :  { %2103 = shalt.err (!%p2100_p6)
}
 0x310   :  { %s2104_s30 = scalar_lea.hbm %s2280_s6, 512 }
 0x311   :  { %p2105_p7 = scmp.ne.s32.totalorder %s2280_s6, %s2104_s30  ;;  %p2108_p8 = scmp.lt.u32.totalorder %s2104_s30, %s2280_s6 }
 0x313   :  { %p2110_p9 = pnand %p2108_p8, %p2105_p7 }
 0x315   :  { %2113 = shalt.err (!%p2110_p9)
}
 0x316   :  { %1579 = dma.vmem_to_hbm [thread:$0]  %s1577_s27, 512, %s2280_s6, [#allocation4]  }
 0x317   :  { %2118 = dma.done.wait [#allocation4], 512  }
 0x318   :  { %2119 = vsyncadd [#allocation4], 4294966784 }
 0x319   :  { %1583 = vsyncpa [#allocation3], 1 }
 0x31a   :  { %1584 = vsyncpa [#allocation6], 1 }
 0x31b   :  { %1585 = vsyncpa [#allocation4], 1 }

</bundles_post_ra>
